<compile_context>
chip_gen: v6e
topology: v6e:2x2x1
jax: 0.10.0
libtpu: 0.0.40
codegen_flags: <defaults>
</compile_context>

<pallas_src>
import functools

import jax
import jax.numpy as jnp
from jax.experimental import pallas as pl
from jax.experimental.pallas import tpu as pltpu

_LANE = 128
_SUBLANE = 8
_MIB = 1024 * 1024
_ITEM = 4  # float32 bytes


def _cdiv(a, b):
    return -(-a // b)


def _round_up(n, m):
    return ((n + m - 1) // m) * m


def _padded_bytes_2d(r, c):
    """VMEM footprint of a 2-D f32 array after (8, 128) tile padding."""
    return _round_up(r, _SUBLANE) * _round_up(c, _LANE) * _ITEM


def _vmem_budget_and_limit():
    """Generation-aware VMEM policy: (fused-path budget, vmem_limit clamp)."""
    cap = None
    try:
        cap = getattr(pltpu.get_tpu_info(), "vmem_capacity_bytes", None)
    except Exception:
        cap = None
    if cap is None:
        cap = 64 * _MIB  # conservative: assume v7x (64 MiB per TensorCore)
    if cap >= 128 * _MIB:            # v5e / v6e: 128 MiB VMEM per core
        return 100 * _MIB, 110 * _MIB
    return 40 * _MIB, 46 * _MIB      # v7x: leave headroom under 64 MiB


# ----------------------------------------------------------------------------
# Fused single-pass kernel: Bt batch elements resident per grid step.
# ----------------------------------------------------------------------------
def _se_fused_kernel(x_ref, w1_ref, b1_ref, w2_ref, b2_ref, o_ref, *, inv_s):
    # x_ref / o_ref: (Bt, C, S).  Read through the ref twice (squeeze, then
    # scale) so no full-block VMEM temp needs to be materialized.
    y = jnp.sum(x_ref[...], axis=-1) * inv_s                            # (Bt, C)
    h = jnp.dot(y, w1_ref[...], preferred_element_type=jnp.float32) + b1_ref[...]
    h = jnp.maximum(h, 0.0)                                             # (Bt, hid)
    s = jnp.dot(h, w2_ref[...], preferred_element_type=jnp.float32) + b2_ref[...]
    s = jax.nn.sigmoid(s)                                               # (Bt, C)
    o_ref[...] = x_ref[...] * s[:, :, None]


def _se_block_fused(x3, w1, b1, w2, b2, bt, vmem_limit):
    B, C, S = x3.shape
    hid = w1.shape[1]
    cost = pl.CostEstimate(
        flops=int(2 * B * C * S + 4 * B * C * hid),
        transcendentals=int(B * C),
        bytes_accessed=int(2 * B * C * S * _ITEM),
    )
    kernel = functools.partial(_se_fused_kernel, inv_s=float(1.0 / S))
    return pl.pallas_call(
        kernel,
        out_shape=jax.ShapeDtypeStruct((B, C, S), jnp.float32),
        grid=(_cdiv(B, bt),),
        in_specs=[
            pl.BlockSpec((bt, C, S), lambda i: (i, 0, 0)),
            pl.BlockSpec((C, hid), lambda i: (0, 0)),
            pl.BlockSpec((1, hid), lambda i: (0, 0)),
            pl.BlockSpec((hid, C), lambda i: (0, 0)),
            pl.BlockSpec((1, C), lambda i: (0, 0)),
        ],
        out_specs=pl.BlockSpec((bt, C, S), lambda i: (i, 0, 0)),
        compiler_params=pltpu.CompilerParams(
            dimension_semantics=("parallel",),
            vmem_limit_bytes=int(vmem_limit),
        ),
        cost_estimate=cost,
    )(x3, w1, b1, w2, b2)


# ----------------------------------------------------------------------------
# Two-pass fallback: feature map too large for one resident batch element.
# ----------------------------------------------------------------------------
def _se_pool_kernel(x_ref, sum_ref, *, inv_s, s_total, s_blk, needs_mask):
    # x_ref: (1, C, s_blk); sum_ref: (1, C, 1) accumulator resident across si.
    si = pl.program_id(1)

    @pl.when(si == 0)
    def _():
        sum_ref[...] = jnp.zeros_like(sum_ref)

    x = x_ref[...]
    if needs_mask:
        # Ragged tail chunk: out-of-bounds lanes hold garbage on reads, so
        # mask them out of the reduction (jnp.where, not multiply, in case the
        # garbage is NaN/Inf).
        lane = jax.lax.broadcasted_iota(jnp.int32, x.shape, dimension=2)
        valid = s_total - si * s_blk
        x = jnp.where(lane < valid, x, 0.0)
    sum_ref[...] += jnp.sum(x, axis=-1, keepdims=True)                  # (1, C, 1)

    @pl.when(si == pl.num_programs(1) - 1)
    def _():
        sum_ref[...] = sum_ref[...] * inv_s


def _se_scale_kernel(m_ref, w1_ref, b1_ref, w2_ref, b2_ref, x_ref, o_ref, gate_ref):
    # m_ref: (1, C, 1) mean; x_ref / o_ref: (1, C, s_blk); gate_ref: (1, C, 1).
    si = pl.program_id(1)

    # Excite MLP folded into pass 2: computed once per batch element (first
    # spatial chunk) into a VMEM scratch that stays resident across si.
    @pl.when(si == 0)
    def _():
        y = m_ref[...][:, :, 0]                                         # (1, C)
        h = jnp.dot(y, w1_ref[...], preferred_element_type=jnp.float32) + b1_ref[...]
        h = jnp.maximum(h, 0.0)
        s = jnp.dot(h, w2_ref[...], preferred_element_type=jnp.float32) + b2_ref[...]
        gate_ref[...] = jax.nn.sigmoid(s)[:, :, None]                   # (1, C, 1)

    # OOB lanes in the tail chunk multiply garbage, but those stores are dropped.
    o_ref[...] = x_ref[...] * gate_ref[...]


def _se_block_two_pass(x3, w1, b1, w2, b2, s_blk, vmem_limit):
    B, C, S = x3.shape
    hid = w1.shape[1]
    n_s = _cdiv(S, s_blk)
    needs_mask = (S % s_blk) != 0

    # Pass 1: per-(batch, channel) mean, spatial reduced in lane-dense chunks.
    pool_kernel = functools.partial(
        _se_pool_kernel, inv_s=float(1.0 / S), s_total=S, s_blk=s_blk,
        needs_mask=needs_mask)
    means = pl.pallas_call(
        pool_kernel,
        out_shape=jax.ShapeDtypeStruct((B, C, 1), jnp.float32),
        grid=(B, n_s),
        in_specs=[pl.BlockSpec((1, C, s_blk), lambda b, si: (b, 0, si))],
        out_specs=pl.BlockSpec((1, C, 1), lambda b, si: (b, 0, 0)),
        compiler_params=pltpu.CompilerParams(
            dimension_semantics=("parallel", "arbitrary"),
            vmem_limit_bytes=int(vmem_limit),
        ),
        cost_estimate=pl.CostEstimate(
            flops=int(B * C * S),
            transcendentals=0,
            bytes_accessed=int(B * C * S * _ITEM + B * C * _ITEM),
        ),
    )(x3)

    # Pass 2: stream x again; gate computed in-kernel on the first chunk.
    return pl.pallas_call(
        _se_scale_kernel,
        out_shape=jax.ShapeDtypeStruct((B, C, S), jnp.float32),
        grid=(B, n_s),
        in_specs=[
            pl.BlockSpec((1, C, 1), lambda b, si: (b, 0, 0)),
            pl.BlockSpec((C, hid), lambda b, si: (0, 0)),
            pl.BlockSpec((1, hid), lambda b, si: (0, 0)),
            pl.BlockSpec((hid, C), lambda b, si: (0, 0)),
            pl.BlockSpec((1, C), lambda b, si: (0, 0)),
            pl.BlockSpec((1, C, s_blk), lambda b, si: (b, 0, si)),
        ],
        out_specs=pl.BlockSpec((1, C, s_blk), lambda b, si: (b, 0, si)),
        scratch_shapes=[pltpu.VMEM((1, C, 1), jnp.float32)],
        compiler_params=pltpu.CompilerParams(
            dimension_semantics=("parallel", "arbitrary"),
            vmem_limit_bytes=int(vmem_limit),
        ),
        cost_estimate=pl.CostEstimate(
            flops=int(B * C * S + 4 * B * C * hid),
            transcendentals=int(B * C),
            bytes_accessed=int(2 * B * C * S * _ITEM + B * C * _ITEM),
        ),
    )(means, w1, b1, w2, b2, x3)


# ----------------------------------------------------------------------------
# Public wrapper
# ----------------------------------------------------------------------------
def se_block(x, w1, b1, w2, b2, *, force_two_pass=False, two_pass_s_blk=None):
    """SEBlock forward. x: (B, C, H, W) f32; w1: (C, hid); b1: (1, hid);
    w2: (hid, C); b2: (1, C). Returns (B, C, H, W)."""
    B, C, H, W = x.shape
    S = H * W

    budget, limit = _vmem_budget_and_limit()

    # Padded (sublane, lane) VMEM footprints.
    c_tile = _round_up(C, _SUBLANE)
    s_tile = _round_up(S, _LANE)
    hid = w1.shape[1]
    weight_bytes = (_padded_bytes_2d(C, hid) + _padded_bytes_2d(1, hid)
                    + _padded_bytes_2d(hid, C) + _padded_bytes_2d(1, C))
    bytes_per_batch = c_tile * s_tile * _ITEM

    x3 = x.reshape(B, C, S)

    # Largest batch tile whose in+out double buffers (+ weights) fit the budget.
    max_bt = (budget - 2 * weight_bytes) // (4 * bytes_per_batch)
    use_fused = (not force_two_pass) and max_bt >= 1

    if use_fused:
        bt = int(min(max_bt, B))
        if B >= 2:
            # Keep >= 2 grid iterations so both v7x TensorCores get work.
            bt = min(bt, _cdiv(B, 2))
        bt = max(bt, 1)
        block_bytes = bt * bytes_per_batch
        vmem_limit = min(max(4 * block_bytes + 4 * weight_bytes + 4 * _MIB,
                             32 * _MIB), limit)
        out3 = _se_block_fused(x3, w1, b1, w2, b2, bt, vmem_limit)
    else:
        if two_pass_s_blk is not None:
            s_blk = int(two_pass_s_blk)   # must be a multiple of 128 (or >= S)
        else:
            max_lanes = max((budget // 2) // (4 * c_tile * _ITEM), _LANE)
            s_blk = max((min(max_lanes, s_tile) // _LANE) * _LANE, _LANE)
        if s_blk >= S:
            s_blk = S                     # full extent: single chunk, no mask
        blk_bytes = c_tile * _round_up(s_blk, _LANE) * _ITEM
        vmem_limit = min(max(4 * blk_bytes + 4 * weight_bytes + 4 * _MIB,
                             32 * _MIB), limit)
        out3 = _se_block_two_pass(x3, w1, b1, w2, b2, s_blk, vmem_limit)

    return out3.reshape(B, C, H, W)


def se_block_ref(x, w1, b1, w2, b2):
    """Pure-JAX reference mirroring the PyTorch forward."""
    y = jnp.mean(x, axis=(2, 3))                      # avg_pool(1).view(b, c)
    y = jax.nn.relu(y @ w1 + b1)
    y = jax.nn.sigmoid(y @ w2 + b2)
    return x * y[:, :, None, None]


if __name__ == "__main__":
    key = jax.random.PRNGKey(0)

    def make_params(k, C, hid):
        kw1, kb1, kw2, kb2 = jax.random.split(k, 4)
        bound1 = 1.0 / float(C) ** 0.5
        w1 = jax.random.uniform(kw1, (C, hid), jnp.float32, -bound1, bound1)
        b1 = jax.random.uniform(kb1, (1, hid), jnp.float32, -bound1, bound1)
        bound2 = 1.0 / float(hid) ** 0.5
        w2 = jax.random.uniform(kw2, (hid, C), jnp.float32, -bound2, bound2)
        b2 = jax.random.uniform(kb2, (1, C), jnp.float32, -bound2, bound2)
        return w1, b1, w2, b2

    # Case 1: SEBlock(channels=32, reduction=16) — fused single-pass path.
    k1, k2, key = jax.random.split(key, 3)
    B, C, H, W = 2, 32, 8, 8
    hid = C // 16
    x = jax.random.normal(k1, (B, C, H, W), dtype=jnp.float32)
    w1, b1, w2, b2 = make_params(k2, C, hid)
    ref = se_block_ref(x, w1, b1, w2, b2)

    out = jax.block_until_ready(se_block(x, w1, b1, w2, b2))
    assert out.shape == (B, C, H, W)
    assert jnp.allclose(out, ref, atol=1e-5, rtol=1e-5), "fused path mismatch"

    # Case 2: same inputs via the two-pass fallback (large-feature-map route).
    out2 = jax.block_until_ready(se_block(x, w1, b1, w2, b2, force_two_pass=True))
    assert jnp.allclose(out2, ref, atol=1e-5, rtol=1e-5), "two-pass path mismatch"

    # Case 3: ragged spatial extent (S = 10*13 = 130, not a multiple of 128),
    # exercising the fused full-dim block and the two-pass tail mask.
    k3, k4 = jax.random.split(key, 2)
    B, C, H, W = 2, 8, 10, 13
    hid = C // 4
    x = jax.random.normal(k3, (B, C, H, W), dtype=jnp.float32)
    w1, b1, w2, b2 = make_params(k4, C, hid)
    ref = se_block_ref(x, w1, b1, w2, b2)

    out = jax.block_until_ready(se_block(x, w1, b1, w2, b2))
    assert jnp.allclose(out, ref, atol=1e-5, rtol=1e-5), "fused ragged-S mismatch"
    out2 = jax.block_until_ready(
        se_block(x, w1, b1, w2, b2, force_two_pass=True, two_pass_s_blk=128))
    assert jnp.allclose(out2, ref, atol=1e-5, rtol=1e-5), "two-pass ragged-S mismatch"

    print("KERNEL_OK")
</pallas_src>

<mosaic_0001>
module attributes {stable_mosaic.version = 11 : i64} {
  func.func @_se_fused_kernel(%arg0: i32, %arg1: memref<1x32x64xf32, #tpu.memory_space<vmem>>, %arg2: memref<32x2xf32, #tpu.memory_space<vmem>>, %arg3: memref<1x2xf32, #tpu.memory_space<vmem>>, %arg4: memref<2x32xf32, #tpu.memory_space<vmem>>, %arg5: memref<1x32xf32, #tpu.memory_space<vmem>>, %arg6: memref<1x32x64xf32, #tpu.memory_space<vmem>>) attributes {dimension_semantics = [#tpu.dimension_semantics<parallel>], iteration_bounds = array<i64: 2>, scalar_prefetch = 0 : i64, scratch_operands = 0 : i64, tpu.core_type = #tpu.core_type<tc>, window_params = [{transform_indices = @transform_0, window_bounds = array<i64: 1, 32, 64>}, {pipeline_mode = #tpu.pipeline_mode<synchronous>, transform_indices = @transform_1, window_bounds = array<i64: 32, 2>}, {pipeline_mode = #tpu.pipeline_mode<synchronous>, transform_indices = @transform_2, window_bounds = array<i64: 1, 2>}, {pipeline_mode = #tpu.pipeline_mode<synchronous>, transform_indices = @transform_3, window_bounds = array<i64: 2, 32>}, {pipeline_mode = #tpu.pipeline_mode<synchronous>, transform_indices = @transform_4, window_bounds = array<i64: 1, 32>}, {transform_indices = @transform_5, window_bounds = array<i64: 1, 32, 64>}]} {
    %c0 = arith.constant 0 : index
    %c0_0 = arith.constant 0 : index
    %c0_1 = arith.constant 0 : index
    %0 = vector.load %arg1[%c0, %c0_0, %c0_1] : memref<1x32x64xf32, #tpu.memory_space<vmem>>, vector<1x32x64xf32>
    %cst = arith.constant dense<0.000000e+00> : vector<1x32xf32>
    %1 = vector.multi_reduction <add>, %0, %cst [2] : vector<1x32x64xf32> to vector<1x32xf32>
    %cst_2 = arith.constant 1.562500e-02 : f32
    %2 = vector.broadcast %cst_2 : f32 to vector<1x32xf32>
    %3 = arith.mulf %1, %2 : vector<1x32xf32>
    %c0_3 = arith.constant 0 : index
    %c0_4 = arith.constant 0 : index
    %4 = vector.load %arg2[%c0_3, %c0_4] : memref<32x2xf32, #tpu.memory_space<vmem>>, vector<32x2xf32>
    %cst_5 = arith.constant dense<0.000000e+00> : vector<1x2xf32>
    %5 = tpu.matmul %3, %4, %cst_5 {dimension_numbers = #tpu.dot_dimension_numbers<[1], [0], [0], [1], [0, 0, 1, 1], [], []>} : vector<1x32xf32>, vector<32x2xf32>, vector<1x2xf32> -> vector<1x2xf32>
    %c0_6 = arith.constant 0 : index
    %c0_7 = arith.constant 0 : index
    %6 = vector.load %arg3[%c0_6, %c0_7] : memref<1x2xf32, #tpu.memory_space<vmem>>, vector<1x2xf32>
    %7 = arith.addf %5, %6 : vector<1x2xf32>
    %cst_8 = arith.constant 0.000000e+00 : f32
    %8 = vector.broadcast %cst_8 : f32 to vector<1x2xf32>
    %9 = arith.maximumf %7, %8 : vector<1x2xf32>
    %c0_9 = arith.constant 0 : index
    %c0_10 = arith.constant 0 : index
    %10 = vector.load %arg4[%c0_9, %c0_10] : memref<2x32xf32, #tpu.memory_space<vmem>>, vector<2x32xf32>
    %cst_11 = arith.constant dense<0.000000e+00> : vector<1x32xf32>
    %11 = tpu.matmul %9, %10, %cst_11 {dimension_numbers = #tpu.dot_dimension_numbers<[1], [0], [0], [1], [0, 0, 1, 1], [], []>} : vector<1x2xf32>, vector<2x32xf32>, vector<1x32xf32> -> vector<1x32xf32>
    %c0_12 = arith.constant 0 : index
    %c0_13 = arith.constant 0 : index
    %12 = vector.load %arg5[%c0_12, %c0_13] : memref<1x32xf32, #tpu.memory_space<vmem>>, vector<1x32xf32>
    %13 = arith.addf %11, %12 : vector<1x32xf32>
    %14 = arith.negf %13 : vector<1x32xf32>
    %15 = math.exp %14 : vector<1x32xf32>
    %cst_14 = arith.constant 1.000000e+00 : f32
    %16 = vector.broadcast %cst_14 : f32 to vector<1x32xf32>
    %17 = arith.addf %16, %15 : vector<1x32xf32>
    %18 = arith.divf %16, %17 : vector<1x32xf32>
    %c0_15 = arith.constant 0 : index
    %c0_16 = arith.constant 0 : index
    %c0_17 = arith.constant 0 : index
    %19 = vector.load %arg1[%c0_15, %c0_16, %c0_17] : memref<1x32x64xf32, #tpu.memory_space<vmem>>, vector<1x32x64xf32>
    %20 = vector.shape_cast %18 : vector<1x32xf32> to vector<1x32x1xf32>
    %21 = vector.broadcast %20 : vector<1x32x1xf32> to vector<1x32x64xf32>
    %22 = arith.mulf %19, %21 : vector<1x32x64xf32>
    %c0_18 = arith.constant 0 : index
    %c0_19 = arith.constant 0 : index
    %c0_20 = arith.constant 0 : index
    %23 = vector.load %arg6[%c0_18, %c0_19, %c0_20] : memref<1x32x64xf32, #tpu.memory_space<vmem>>, vector<1x32x64xf32>
    tpu.vector_store %arg6[%c0_18, %c0_19, %c0_20], %22 {strides = array<i32>} : memref<1x32x64xf32, #tpu.memory_space<vmem>>, vector<1x32x64xf32>,
    return
  }
  func.func @transform_0(%arg0: i32) -> (i32, i32, i32) {
    %c0_i32 = arith.constant 0 : i32
    %c0_i32_0 = arith.constant 0 : i32
    %c0_i32_1 = arith.constant 0 : i32
    return %arg0, %c0_i32, %c0_i32_0 : i32, i32, i32
  }
  func.func @transform_1(%arg0: i32) -> (i32, i32) {
    %c0_i32 = arith.constant 0 : i32
    %c0_i32_0 = arith.constant 0 : i32
    %c0_i32_1 = arith.constant 0 : i32
    return %c0_i32, %c0_i32_0 : i32, i32
  }
  func.func @transform_2(%arg0: i32) -> (i32, i32) {
    %c0_i32 = arith.constant 0 : i32
    %c0_i32_0 = arith.constant 0 : i32
    %c0_i32_1 = arith.constant 0 : i32
    return %c0_i32, %c0_i32_0 : i32, i32
  }
  func.func @transform_3(%arg0: i32) -> (i32, i32) {
    %c0_i32 = arith.constant 0 : i32
    %c0_i32_0 = arith.constant 0 : i32
    %c0_i32_1 = arith.constant 0 : i32
    return %c0_i32, %c0_i32_0 : i32, i32
  }
  func.func @transform_4(%arg0: i32) -> (i32, i32) {
    %c0_i32 = arith.constant 0 : i32
    %c0_i32_0 = arith.constant 0 : i32
    %c0_i32_1 = arith.constant 0 : i32
    return %c0_i32, %c0_i32_0 : i32, i32
  }
  func.func @transform_5(%arg0: i32) -> (i32, i32, i32) {
    %c0_i32 = arith.constant 0 : i32
    %c0_i32_0 = arith.constant 0 : i32
    %c0_i32_1 = arith.constant 0 : i32
    return %arg0, %c0_i32, %c0_i32_0 : i32, i32, i32
  }
}

</mosaic_0001>

<bundles_post_ra>
// kernel: tpu_custom_call.1
= control target key start
LH: loop header
LB: loop body
LE: loop exit
PB: predicated region body
PF: predicated region fallthrough
CT: control target
= control target key end

     0   :  { %10 = vsyncpa [#allocation3], 0  ;;  %s1008_s0 = inlined_call_operand.hbm [shape: f32[2,32,64], index: 0, kind: input, shape index: {}]   ;;  %s1009_s1 = inlined_call_operand.vmem [shape: f32[32,2], index: 1, kind: input, shape index: {}]   ;;  %s1010_s2 = inlined_call_operand.vmem [shape: f32[1,2], index: 2, kind: input, shape index: {}]   ;;  %s1011_s3 = inlined_call_operand.vmem [shape: f32[2,32], index: 3, kind: input, shape index: {}]   ;;  %s1012_s4 = inlined_call_operand.vmem [shape: f32[1,32], index: 4, kind: input, shape index: {}]   ;;  %s1013_s5 = inlined_call_operand.hbm [shape: f32[2,32,64], index: 5, kind: output, shape index: {}]  }
   0x1   :  { %12 = vsyncpa [#allocation3 + $0x1], 0 }
   0x2   :  { %13 = vsyncpa [#allocation4], 0 }
   0x3   :  { %15 = vsyncpa [#allocation4 + $0x1], 0  ;;  %s805_s18 = smov 0   ;;  %s807_s19 = smov 0  }
   0x4   :  { %s809_s20 = smov 0   ;;  %s811_s21 = smov 0  }
   0x5 LB: > { %s826_s22 = sadd.s32 4294967295, %s765_s21   ;;  %s574_s23 = sadd.s32 4294967294, %s765_s21   ;;  %s765_s21 = sphi %s811_s21, %s1028_s21   ;;  %s761_s20 = sphi %s809_s20, %s1027_s20   ;;  %s757_s19 = sphi %s807_s19, %s1026_s19   ;;  %s753_s18 = sphi %s805_s18, %s1025_s18  }
   0x6   : > { %s830_s24 = sadd.s32 1, %s765_s21   ;;  %s28_s25 = sadd.s32 1, %s761_s20 }
   0x7   : > { %s25_s26 = ssub.s32 %s765_s21, %s830_s24  ;;  %p35_p0 = scmp.ne.s32.totalorder %s761_s20, %s757_s19 }
   0x8   : > { %p26_p1 = scmp.eq.s32.totalorder %s25_s26, 0  ;;  %p36_p2 = scmp.eq.s32.totalorder %s765_s21, 0 }
   0x9   : > { %p41_p3 = scmp.ne.s32.totalorder %s757_s19, %s753_s18  ;;  %p42_p4 = scmp.eq.s32.totalorder %s826_s22, 0 }
   0xa   : > { %s842_s27 = scalar_select %p26_p1, %s761_s20, %s28_s25  }
   0xb   : > { %p844_p5 = por %p36_p2, %p35_p0  ;;  %p848_p6 = por %p42_p4, %p41_p3 }
   0xc   : > { %p149_p7 = scmp.eq.s32.totalorder %s826_s22, 1  ;;  %p155_p8 = scmp.eq.s32.totalorder %s574_s23, 1 }
   0xd   : > { %s1017_s29 = scalar_select %p848_p6, 1, 0 }
   0xe   : > { %p629_p10 = scmp.lt.s32.totalorder %s765_s21, 2  ;;  %p855_p11 = por %p149_p7, %p35_p0 }
   0xf   : > { %p859_p12 = por %p155_p8, %p41_p3  ;;  %s187_s7 = sand.u32 1, %s761_s20  }
  0x10   : > { %s1018_s30 = scalar_select %p855_p11, 1, 0 }
  0x11   : > { %s1019_s6 = scalar_select %p859_p12, 1, 0 }
  0x12   : > { %s592_s8 = sshll.u32 %s765_s21, 9  ;;  %s577_s9 = sshll.u32 %s187_s7, 5 }
  0x13   : > { %s868_s12 = scalar_lea.hbm %s1008_s0, %s592_s8  ;;  %s191_s13 = scalar_lea.vmem [#allocation2], %s577_s9 }
  0x14   : > { %s198_s14 = sshll.u32 %s191_s13, 4  ;;  %p872_p13 = pnand %p629_p10, %p844_p5  ;;  %s876_s14 = int_to_ptr.vmem [resolvable:$true] %s198_s14 }
  0x15   : > { %s878_s16 = scalar_lea.sflag [#allocation3], %s187_s7  ;;  %s673_s17 = scalar_lea.hbm %s868_s12, 512 }
  0x16   : > { %p674_p0 = scmp.ne.s32.totalorder %s868_s12, %s673_s17  ;;  %p675_p1 = pneg %p872_p13 }
  0x17   : > { %s678_s26 = scalar_lea.hbm %s1008_s0, 1024  ;;  %p679_p4 = scmp.lt.s32.totalorder %s868_s12, %s1008_s0 }
  0x18   : > { %p676_p2 = pnand %p675_p1, %p674_p0  ;;  %p680_p5 = scmp.lt.s32.totalorder %s678_s26, %s673_s17 }
  0x1a   : > { %p677_p3 = pneg %p676_p2  ;;  %p681_p7 = por %p680_p5, %p679_p4 }
  0x1c   : > { %p682_p8 = pnand %p681_p7, %p677_p3 }
  0x1e   : > { %685 = shalt.err (!%p682_p8)
}
  0x1f   : > { %s686_s7 = scalar_lea.vmem %s876_s14, 512  ;;  %s767_s9 = smov [#allocation2]  }
  0x20   : > { %p687_p10 = scmp.ne.s32.totalorder %s876_s14, %s686_s7  ;;  %s691_s10 = sshll.u32 %s767_s9, 4  ;;  %s692_s10 = int_to_ptr.vmem [resolvable:$false] %s691_s10 }
  0x21   : > { %s693_s11 = scalar_lea.vmem %s692_s10, 1024  ;;  %p694_p2 = scmp.lt.s32.totalorder %s876_s14, %s692_s10 }
  0x22   : > { %p689_p9 = pnand %p687_p10, %p675_p1  ;;  %p695_p12 = scmp.lt.s32.totalorder %s693_s11, %s686_s7 }
  0x24   : > { %p690_p0 = pneg %p689_p9  ;;  %p696_p11 = por %p695_p12, %p694_p2 }
  0x26   : > { %p697_p6 = pnand %p696_p11, %p690_p0 }
  0x28   : > { %700 = shalt.err (!%p697_p6)
}
  0x29   : > { %s768_s13 = smov 128   ;;  %s769_s17 = smov 8  }
  0x2a   : > { %624 = dma.hbm_to_vmem [thread:$0]  (!%p872_p13), %s868_s12, 512, %s876_s14, %s878_s16, %s768_s13, %s768_s13, %s769_s17  }
  0x2b   : > { %p580_p9 = scmp.ge.s32.totalorder %s765_s21, 1  ;;  %p206_p1 = scmp.lt.s32.totalorder %s765_s21, 3 }
  0x2d   : > { %p207_p3 = pnand %p580_p9, %p206_p1 }
  0x2e   : > { %s902_s23 = sand.u32 (!%p207_p3), 1, %s757_s19   ;;  %p1021_p6 = scmp.ne.s32.totalorder (!%p207_p3), %s1017_s29, 0 }
  0x2f   : > { %210 = sbr.rel (%p207_p3) target bundleno = 769 (0x301), region = 40  ;;  %s581_s25 = sshll.u32 (!%p207_p3), %s902_s23, 5 }
  0x30   : > { %s213_s26 = scalar_lea.sflag (!%p207_p3), [#allocation3], %s902_s23  ;;  %s216_s28 = scalar_lea.vmem (!%p207_p3), [#allocation2], %s581_s25 }
  0x34   : > { %744 = dma.done.wait (%p1021_p6), %s213_s26, 512  }
  0x35   : > { %746 = vsyncadd (%p1021_p6), %s213_s26, 4294966784  ;;  %vm247_vm0 = vcmask 523264   ;;  %v912_v0 = vld [vmem:[%s216_s28] sm:$0xff]  ;;  %v914_v1 = vld [vmem:[%s216_s28 + $0x10] sm:$0xff]  ;;  %v770_v8 = vmov 0.0   ;;  %vm771_vm1 = vmmov 0   ;;  %v273_v13 = vlaneseq }
  0x36   : > { %v916_v2 = vld [vmem:[%s216_s28 + $0x8] sm:$0xff]  ;;  %v248_v3 = vsel %vm247_vm0, %v912_v0, 0.0  ;;  %v254_v4 = vsel %vm247_vm0, %v914_v1, 0.0  ;;  %v922_v5 = vld [vmem:[%s216_s28 + $0x18] sm:$0xff]  ;;  %601 = vmatprep.subr.mxu0 %v770_v8  ;;  %612 = vmatprep.subr.mxu1 %v770_v8  ;;  %v266_v10 = vld [vmem:[%s1009_s1 + $0x10] sm:$0xff]  ;;  %vm284_vm2 = vcmask 130112  }
  0x37   : > { %249 = vadd.xlane.f32.xlu0 %v248_v3  ;;  %255 = vadd.xlane.f32.xlu1 %v254_v4  ;;  %v251_v6 = vsel %vm247_vm0, %v916_v2, 0.0  ;;  %v257_v7 = vsel %vm247_vm0, %v922_v5, 0.0  ;;  %v267_v9 = vld [vmem:[%s1009_s1 + $0x18] sm:$0xff]  ;;  %v265_v11 = vld [vmem:[%s1009_s1 + $0x8] sm:$0xff]  ;;  %v264_v12 = vld [vmem:[%s1009_s1] sm:$0xff]  ;;  %v274_v14 = vand.u32 127, %v273_v13 }
  0x38   : > { %602 = vmatpush3.msra.mxu0 %v267_v9  ;;  %609 = vmatprep.mubr.msk.f32.mxu0 %vm771_vm1, %v770_v8  ;;  %v276_v15 = vshrl.u32 %v273_v13, 7  ;;  %vm291_vm3 = vcmask 195712   ;;  %vm298_vm4 = vcmask 261312   ;;  %vm300_vm5 = vcmask 261120   ;;  %v374_v38 = vld [vmem:[%s1011_s3] sm:$0x3] }
  0x39   : > { %603 = vmatprep.subr.mxu0 %v770_v8  ;;  %614 = vmatprep.mubr.msk.f32.mxu1 %vm771_vm1, %v770_v8  ;;  %v279_v16 = vadd.s32 4294967288, %v274_v14  ;;  %v293_v17 = vadd.s32 4294967272, %v274_v14  ;;  %v286_v19 = vadd.s32 4294967280, %v274_v14  ;;  %vm380_vm6 = vcmask 1041408   ;;  %v268_v39 = vld [vmem:[%s1010_s2] sm:$0x1] }
  0x3a   : > { %604 = vmatpush3.msra.mxu0 %v266_v10  ;;  %v277_v21 = vsub.s32 %v274_v14, %v276_v15  ;;  %613 = vmatpush3.msk.msra.mxu1 %vm380_vm6, %v374_v38  ;;  %vm376_vm7 = vcmask 15360   ;;  %v375_v44 = vld [vmem:[%s1012_s4] sm:$0x1]  ;;  %v462_v51 = vsub.s32 0, %v276_v15  ;;  %s242_s29 = scalar_lea.vmem [#allocation5], %s581_s25  ;;  %s593_s14 = sshll.u32 %s826_s22, 9 }
  0x3b   : > { %252 = vadd.xlane.f32.xlu0 %v251_v6  ;;  %258 = vadd.xlane.f32.xlu1 %v257_v7  ;;  %v282_v23 = vsub.s32 %v279_v16, %v276_v15  ;;  %v296_v24 = vsub.s32 %v293_v17, %v276_v15  ;;  %v289_v25 = vsub.s32 %v286_v19, %v276_v15  ;;  %s501_s12 = sshll.u32 %s242_s29, 4  ;;  %s963_s16 = scalar_lea.hbm %s1013_s5, %s593_s14  ;;  %s957_s12 = int_to_ptr.vmem [resolvable:$true] %s501_s12 }
  0x3c   : > { %605 = vmatprep.subr.mxu0 %v770_v8  ;;  %s488_s8 = scalar_lea.sflag [#allocation4], %s902_s23  ;;  %s701_s7 = scalar_lea.vmem %s957_s12, 512 }
  0x3d   : > { %606 = vmatpush3.msra.mxu0 %v265_v11  ;;  %p702_p11 = scmp.ne.s32.totalorder %s957_s12, %s701_s7  ;;  %p1022_p12 = scmp.ne.s32.totalorder %s1018_s30, 0 }
  0x3e   : > { %607 = vmatprep.subr.mxu0 %v770_v8  ;;  %s772_s22 = smov [#allocation5]  }
  0x3f   : > { %608 = vmatpush3.msra.mxu0 %v264_v12  ;;  %p703_p13 = pnand %p702_p11, %p1022_p12  ;;  %s705_s9 = sshll.u32 %s772_s22, 4  ;;  %s706_s9 = int_to_ptr.vmem [resolvable:$false] %s705_s9 }
  0x40   : > { %s707_s10 = scalar_lea.vmem %s706_s9, 1024  ;;  %p708_p5 = scmp.lt.s32.totalorder %s957_s12, %s706_s9 }
  0x41   : > { %p704_p4 = pneg %p703_p13  ;;  %p709_p7 = scmp.lt.s32.totalorder %s707_s10, %s701_s7 }
  0x43   : > { %p710_p8 = por %p709_p7, %p708_p5 }
  0x45   : > { %p711_p10 = pnand %p710_p8, %p704_p4 }
  0xc0   : > { %v250_v18 = vpop.xlane.xlu0 %249  ;;  %v256_v20 = vpop.xlane.xlu1 %255 }
  0xc1   : > { %v260_v22 = vmul.f32 0.015625, %v250_v18  ;;  %v262_v26 = vmul.f32 0.015625, %v256_v20 }
  0xc3   : > { %v278_v31 = vrot.slane %v260_v22, %v277_v21  ;;  %v290_v34 = vrot.slane %v262_v26, %v289_v25 }
  0xc4   : > { %v253_v27 = vpop.xlane.xlu0 %252  ;;  %v259_v28 = vpop.xlane.xlu1 %258 }
  0xc5   : > { %v261_v29 = vmul.f32 0.015625, %v253_v27  ;;  %v263_v30 = vmul.f32 0.015625, %v259_v28 }
  0xc7   : > { %v283_v32 = vrot.slane %v261_v29, %v282_v23  ;;  %v297_v33 = vrot.slane %v263_v30, %v296_v24 }
  0xc9   : > { %v285_v35 = vsel %vm284_vm2, %v283_v32, %v278_v31 }
  0xca   : > { %v292_v36 = vsel %vm291_vm3, %v290_v34, %v285_v35 }
  0xcb   : > { %v299_v37 = vsel %vm298_vm4, %v297_v33, %v292_v36 }
  0xcc   : > { %610 = vmatmul.mubr.msk.f32.vlgmr.msra.gmra.mxu0 %vm300_vm5, %v299_v37 }
 0x18c   : > { %v369_v40 = vpop.f32.mrf.mxu0 }
 0x18d   : > { %v370_v41 = vadd.f32 %v369_v40, %v268_v39 }
 0x18e   : > { %v611_v42 = vpop.f32.mrf.mxu0 }
 0x18f   : > { %v373_v43 = vmax.f32 %v370_v41, 0.0 }
 0x191   : > { %615 = vmatmul.mubr.msk.f32.vlgmr.msra.gmra.mxu1 %vm376_vm7, %v373_v43 }
 0x251   : > { %v450_v45 = vpop.f32.mrf.mxu1 }
 0x252   : > { %v451_v46 = vadd.f32 %v450_v45, %v375_v44 }
 0x253   : > { %v616_v47 = vpop.f32.mrf.mxu1 }
 0x254   : > { %v586_v48 = vmul.f32 -1.442695, %v451_v46 }
 0x256   : > { %669 = vpow2.f32 %v586_v48 }
 0x263   : > { %v670_v49 = vpop.eup %669 }
 0x264   : > { %v457_v50 = vadd.f32 1.0, %v670_v49 }
 0x266   : > { %671 = vrcp.f32 %v457_v50 }
 0x273   : > { %v672_v52 = vpop.eup %671 }
 0x274   : > { %v463_v53 = vrot.slane %v672_v52, %v462_v51 }
 0x276   : > { %469 = vbcast.lane.b32.xlu1 %v463_v53, 264  ;;  %465 = vbcast.lane.b32.xlu0 %v463_v53, 256 }
 0x27a   : > { %473 = vbcast.lane.b32.xlu1 %v463_v53, 272 }
 0x27e   : > { %477 = vbcast.lane.b32.xlu1 %v463_v53, 280 }
 0x2e8   : > { %v470_v54 = vpop.permute.xlu1 %469  ;;  %v466_v55 = vpop.permute.xlu0 %465 }
 0x2e9   : > { %v480_v56 = vmul.f32 %v470_v54, %v916_v2  ;;  %v479_v57 = vmul.f32 %v466_v55, %v912_v0 }
 0x2eb   : > { %484 = vst.msk [vmem:[%s242_s29 + $0x8] sm:$0xff] %vm247_vm0, %v480_v56  ;;  %483 = vst.msk [vmem:[%s242_s29] sm:$0xff] %vm247_vm0, %v479_v57 }
 0x2ec   : > { %v474_v58 = vpop.permute.xlu1 %473 }
 0x2ed   : > { %v481_v59 = vmul.f32 %v474_v58, %v914_v1 }
 0x2ef   : > { %485 = vst.msk [vmem:[%s242_s29 + $0x10] sm:$0xff] %vm247_vm0, %v481_v59 }
 0x2f0   : > { %v478_v60 = vpop.permute.xlu1 %477 }
 0x2f1   : > { %v482_v61 = vmul.f32 %v478_v60, %v922_v5 }
 0x2f3   : > { %486 = vst.msk [vmem:[%s242_s29 + $0x18] sm:$0xff] %vm247_vm0, %v482_v61 }
 0x2f4   : > { %714 = shalt.err (!%p711_p10)
}
 0x2f5   : > { %s715_s11 = scalar_lea.hbm %s963_s16, 512  ;;  %s719_s26 = scalar_lea.hbm %s1013_s5, 1024 }
 0x2f6   : > { %p716_p0 = scmp.ne.s32.totalorder %s963_s16, %s715_s11  ;;  %p720_p1 = scmp.lt.s32.totalorder %s963_s16, %s1013_s5 }
 0x2f7   : > { %p721_p3 = scmp.lt.s32.totalorder %s719_s26, %s715_s11 }
 0x2f8   : > { %p717_p2 = pnand %p716_p0, %p1022_p12 }
 0x2f9   : > { %p722_p6 = por %p721_p3, %p720_p1 }
 0x2fa   : > { %p718_p9 = pneg %p717_p2 }
 0x2fc   : > { %p723_p11 = pnand %p722_p6, %p718_p9 }
 0x2fe   : > { %726 = shalt.err (!%p723_p11)
}
 0x2ff   : > { %s773_s14 = smov 128   ;;  %s774_s15 = smov 8  }
 0x300   : > { %619 = dma.vmem_to_hbm [thread:$0]  (%p1022_p12), %s957_s12, 512, %s963_s16, %s488_s8, %s773_s14, %s773_s14, %s774_s15  }
 0x301 PF: > { %s516_s25 = sand.u32 1, %s753_s18   ;;  %p1023_p13 = scmp.ne.s32.totalorder %s1019_s6, 0 }
 0x302   : > { %p1024_p4 = scmp.ge.s32.totalorder %s765_s21, 2  ;;  %s517_s7 = scalar_lea.sflag [#allocation4], %s516_s25 }
 0x304   : > { %p626_p5 = pnand %p1024_p4, %p1023_p13 }
 0x306   : > { %p627_p7 = pneg %p626_p5 }
 0x308   : > { %748 = dma.done.wait (%p627_p7), %s517_s7, 512  }
 0x309   : > { %750 = vsyncadd (%p627_p7), %s517_s7, 4294966784  ;;  %p18_p8 = scmp.ge.s32.totalorder %s830_s24, 4   ;;  %s1025_s18 = smov %s757_s19 }
 0x30a   : > { %s1026_s19 = smov %s761_s20  ;;  %s1027_s20 = smov %s842_s27 }
 0x30b   : > { %s1028_s21 = smov %s830_s24  ;;  %20 = sbr.rel (!%p18_p8) target bundleno = 5 (0x5), region = 85 }
 0x310   :  { %522 = vsyncpa [#allocation3], 1 }
 0x311   :  { %524 = vsyncpa [#allocation3 + $0x1], 1 }
 0x312   :  { %525 = vsyncpa [#allocation4], 1 }
 0x313   :  { %527 = vsyncpa [#allocation4 + $0x1], 1 }

</bundles_post_ra>
